<compile_context>
chip_gen: v6e
topology: v6e:2x2x1
jax: 0.10.0
libtpu: 0.0.40
codegen_flags: <defaults>
</compile_context>

<pallas_src>
import jax
import jax.numpy as jnp
from jax.experimental import pallas as pl
from jax.experimental.pallas import tpu as pltpu

_LANES = 128
_SUBLANES = 8


def _round_up(a, b):
    return ((a + b - 1) // b) * b


def _hinge_loss_kernel(x_ref, t_ref, out_ref, acc_ref):
    k = pl.program_id(1)  # inner ("arbitrary") reduction axis

    @pl.when(k == 0)
    def _():
        acc_ref[...] = jnp.zeros_like(acc_ref)

    x = x_ref[...].astype(jnp.float32)   # cast in-kernel: bf16 inputs DMA at half bytes
    t = t_ref[...].astype(jnp.float32)
    h = jnp.maximum(1.0 - x * t, 0.0)    # hinge with margin 1.0
    br = h.shape[0]
    # Reduce the leading block axis in vreg-aligned (8,128) slabs: pure VALU
    # adds into the resident accumulator; no per-step cross-lane reduction and
    # no lane-sparse scalar store in the hot loop.
    acc_ref[...] += jnp.sum(h.reshape(br // _SUBLANES, _SUBLANES, _LANES), axis=0)

    @pl.when(k == pl.num_programs(1) - 1)
    def _():
        out_ref[...] = acc_ref[...]


def hinge_loss(x, target, *, block_rows=2048, num_shards=2):
    """Pallas TPU implementation of HingeLoss.forward(input, target)."""
    assert x.shape == target.shape
    n = x.size

    rows_raw = -(-n // _LANES)  # ceil
    # Block rows: multiple of 32 (safe for f32 / bf16 / int8 packed tiling),
    # clamped so the block never exceeds the (rounded-up) data.
    br = max(32, min(int(block_rows), _round_up(rows_raw, 32)))
    br = _round_up(br, 32)
    # Only use >1 parallel shard when there is enough work (v7x megacore).
    shards = num_shards if rows_raw >= num_shards * br else 1
    rows = _round_up(rows_raw, shards * br)
    steps = rows // (shards * br)

    pad = rows * _LANES - n
    xf = jnp.ravel(x)
    tf = jnp.ravel(target)
    if pad:
        # x=1, t=1  ->  relu(1 - 1*1) = 0: padded elements contribute nothing.
        xf = jnp.concatenate([xf, jnp.ones((pad,), xf.dtype)])
        tf = jnp.concatenate([tf, jnp.ones((pad,), tf.dtype)])
    x2 = xf.reshape(rows, _LANES)
    t2 = tf.reshape(rows, _LANES)

    in_bytes = x2.size * x2.dtype.itemsize + t2.size * t2.dtype.itemsize
    out_bytes = shards * _SUBLANES * _LANES * 4
    cost = pl.CostEstimate(
        flops=3 * rows * _LANES,          # mul, sub, max (+ accum)
        transcendentals=0,
        bytes_accessed=in_bytes + out_bytes,
    )

    partial = pl.pallas_call(
        _hinge_loss_kernel,
        out_shape=jax.ShapeDtypeStruct((shards * _SUBLANES, _LANES), jnp.float32),
        grid_spec=pltpu.PrefetchScalarGridSpec(
            num_scalar_prefetch=0,
            grid=(shards, steps),
            in_specs=[
                pl.BlockSpec((br, _LANES), lambda s, k: (s * steps + k, 0)),
                pl.BlockSpec((br, _LANES), lambda s, k: (s * steps + k, 0)),
            ],
            out_specs=pl.BlockSpec((_SUBLANES, _LANES), lambda s, k: (s, 0)),
            scratch_shapes=[pltpu.VMEM((_SUBLANES, _LANES), jnp.float32)],
        ),
        compiler_params=pltpu.CompilerParams(
            dimension_semantics=("parallel", "arbitrary"),
        ),
        cost_estimate=cost,
    )(x2, t2)

    # One tiny cross-lane reduce outside the kernel; divide by the TRUE n.
    return jnp.sum(partial) * (1.0 / float(n))


if __name__ == "__main__":
    key = jax.random.PRNGKey(0)
    k1, k2, k3, k4 = jax.random.split(key, 4)

    # Primary: small logits-style NCHW input with +/-1 targets.
    shape = (2, 4, 16, 16)
    x = jax.random.normal(k1, shape, dtype=jnp.float32)
    t = jnp.where(jax.random.bernoulli(k2, 0.5, shape), 1.0, -1.0).astype(jnp.float32)
    loss = jax.block_until_ready(hinge_loss(x, t))
    ref = jnp.mean(jnp.maximum(1.0 - x * t, 0.0))
    assert jnp.allclose(loss, ref, rtol=1e-5, atol=1e-6), (loss, ref)

    # Padding path: numel not a multiple of 128 (padded elements contribute 0).
    shape_b = (3, 5, 7, 11)
    xb = jax.random.normal(k3, shape_b, dtype=jnp.float32)
    tb = jnp.where(jax.random.bernoulli(k4, 0.5, shape_b), 1.0, -1.0).astype(jnp.float32)
    loss_b = jax.block_until_ready(hinge_loss(xb, tb))
    ref_b = jnp.mean(jnp.maximum(1.0 - xb * tb, 0.0))
    assert jnp.allclose(loss_b, ref_b, rtol=1e-5, atol=1e-6), (loss_b, ref_b)

    # Multi-step / multi-shard path (small block to exercise the 2-D grid).
    shape_c = (8, 16, 32, 32)
    xc = jax.random.normal(k1, shape_c, dtype=jnp.float32)
    tc = jnp.where(jax.random.bernoulli(k2, 0.5, shape_c), 1.0, -1.0).astype(jnp.float32)
    loss_c = jax.block_until_ready(hinge_loss(xc, tc, block_rows=64, num_shards=2))
    ref_c = jnp.mean(jnp.maximum(1.0 - xc * tc, 0.0))
    assert jnp.allclose(loss_c, ref_c, rtol=1e-5, atol=1e-6), (loss_c, ref_c)

    print("KERNEL_OK")
</pallas_src>

<mosaic_0001>
module attributes {stable_mosaic.version = 11 : i64} {
  func.func @_hinge_loss_kernel(%arg0: i32, %arg1: i32, %arg2: memref<32x128xf32, #tpu.memory_space<vmem>>, %arg3: memref<32x128xf32, #tpu.memory_space<vmem>>, %arg4: memref<8x128xf32, #tpu.memory_space<vmem>>, %arg5: memref<8x128xf32, #tpu.memory_space<vmem>>) attributes {dimension_semantics = [#tpu.dimension_semantics<parallel>, #tpu.dimension_semantics<arbitrary>], iteration_bounds = array<i64: 1, 1>, scalar_prefetch = 0 : i64, scratch_operands = 1 : i64, tpu.core_type = #tpu.core_type<tc>, window_params = [{transform_indices = @transform_0, window_bounds = array<i64: 32, 128>}, {transform_indices = @transform_1, window_bounds = array<i64: 32, 128>}, {transform_indices = @transform_2, window_bounds = array<i64: 8, 128>}]} {
    %c0_i32 = arith.constant 0 : i32
    %0 = arith.cmpi eq, %arg1, %c0_i32 : i32
    %1 = arith.extui %0 : i1 to i32
    %c0_i32_0 = arith.constant 0 : i32
    %2 = arith.cmpi ne, %1, %c0_i32_0 : i32
    scf.if %2 {
      %cst_12 = arith.constant 0.000000e+00 : f32
      %18 = vector.broadcast %cst_12 : f32 to vector<8x128xf32>
      %c0_13 = arith.constant 0 : index
      %c0_14 = arith.constant 0 : index
      %19 = vector.load %arg5[%c0_13, %c0_14] : memref<8x128xf32, #tpu.memory_space<vmem>>, vector<8x128xf32>
      tpu.vector_store %arg5[%c0_13, %c0_14], %18 {strides = array<i32>} : memref<8x128xf32, #tpu.memory_space<vmem>>, vector<8x128xf32>,
    } else {
    }
    %c0 = arith.constant 0 : index
    %c0_1 = arith.constant 0 : index
    %3 = vector.load %arg2[%c0, %c0_1] : memref<32x128xf32, #tpu.memory_space<vmem>>, vector<32x128xf32>
    %c0_2 = arith.constant 0 : index
    %c0_3 = arith.constant 0 : index
    %4 = vector.load %arg3[%c0_2, %c0_3] : memref<32x128xf32, #tpu.memory_space<vmem>>, vector<32x128xf32>
    %5 = arith.mulf %3, %4 : vector<32x128xf32>
    %cst = arith.constant 1.000000e+00 : f32
    %6 = vector.broadcast %cst : f32 to vector<32x128xf32>
    %7 = arith.subf %6, %5 : vector<32x128xf32>
    %cst_4 = arith.constant 0.000000e+00 : f32
    %8 = vector.broadcast %cst_4 : f32 to vector<32x128xf32>
    %9 = arith.maximumf %7, %8 : vector<32x128xf32>
    %c0_5 = arith.constant 0 : index
    %c0_6 = arith.constant 0 : index
    %10 = vector.load %arg5[%c0_5, %c0_6] : memref<8x128xf32, #tpu.memory_space<vmem>>, vector<8x128xf32>
    %11 = vector.shape_cast %9 : vector<32x128xf32> to vector<4x8x128xf32>
    %cst_7 = arith.constant dense<0.000000e+00> : vector<8x128xf32>
    %12 = vector.multi_reduction <add>, %11, %cst_7 [0] : vector<4x8x128xf32> to vector<8x128xf32>
    %13 = arith.addf %10, %12 : vector<8x128xf32>
    %c0_8 = arith.constant 0 : index
    %c0_9 = arith.constant 0 : index
    %14 = vector.load %arg5[%c0_8, %c0_9] : memref<8x128xf32, #tpu.memory_space<vmem>>, vector<8x128xf32>
    tpu.vector_store %arg5[%c0_8, %c0_9], %13 {strides = array<i32>} : memref<8x128xf32, #tpu.memory_space<vmem>>, vector<8x128xf32>,
    %c0_i32_10 = arith.constant 0 : i32
    %15 = arith.cmpi eq, %arg1, %c0_i32_10 : i32
    %16 = arith.extui %15 : i1 to i32
    %c0_i32_11 = arith.constant 0 : i32
    %17 = arith.cmpi ne, %16, %c0_i32_11 : i32
    scf.if %17 {
      %c0_12 = arith.constant 0 : index
      %c0_13 = arith.constant 0 : index
      %18 = vector.load %arg5[%c0_12, %c0_13] : memref<8x128xf32, #tpu.memory_space<vmem>>, vector<8x128xf32>
      %c0_14 = arith.constant 0 : index
      %c0_15 = arith.constant 0 : index
      %19 = vector.load %arg4[%c0_14, %c0_15] : memref<8x128xf32, #tpu.memory_space<vmem>>, vector<8x128xf32>
      tpu.vector_store %arg4[%c0_14, %c0_15], %18 {strides = array<i32>} : memref<8x128xf32, #tpu.memory_space<vmem>>, vector<8x128xf32>,
    } else {
    }
    return
  }
  func.func @transform_0(%arg0: i32, %arg1: i32) -> (i32, i32) {
    %c1_i32 = arith.constant 1 : i32
    %0 = arith.muli %arg0, %c1_i32 : i32
    %1 = arith.addi %0, %arg1 : i32
    %c0_i32 = arith.constant 0 : i32
    %c0_i32_0 = arith.constant 0 : i32
    return %1, %c0_i32 : i32, i32
  }
  func.func @transform_1(%arg0: i32, %arg1: i32) -> (i32, i32) {
    %c1_i32 = arith.constant 1 : i32
    %0 = arith.muli %arg0, %c1_i32 : i32
    %1 = arith.addi %0, %arg1 : i32
    %c0_i32 = arith.constant 0 : i32
    %c0_i32_0 = arith.constant 0 : i32
    return %1, %c0_i32 : i32, i32
  }
  func.func @transform_2(%arg0: i32, %arg1: i32) -> (i32, i32) {
    %c0_i32 = arith.constant 0 : i32
    %c0_i32_0 = arith.constant 0 : i32
    return %arg0, %c0_i32 : i32, i32
  }
}

</mosaic_0001>

<bundles_post_ra>
// kernel: tpu_custom_call.1
= control target key start
LH: loop header
LB: loop body
LE: loop exit
PB: predicated region body
PF: predicated region fallthrough
CT: control target
= control target key end

     0   :  { %7 = vsyncpa [#allocation4], 0  ;;  %s204_s0 = inlined_call_operand.hbm [shape: f32[32,128], index: 0, kind: input, shape index: {}]   ;;  %s205_s1 = inlined_call_operand.hbm [shape: f32[32,128], index: 1, kind: input, shape index: {}]   ;;  %s206_s2 = inlined_call_operand.hbm [shape: f32[8,128], index: 2, kind: output, shape index: {}]  }
   0x1   :  { %8 = vsyncpa [#allocation7], 0 }
   0x2   :  { %9 = vsyncpa [#allocation5], 0  ;;  %s175_s9 = smov [#allocation3]  }
   0x3   :  { %s19_s10 = sshll.u32 %s175_s9, 4  ;;  %s20_s10 = int_to_ptr.vmem [resolvable:$true] %s19_s10 }
   0x4   :  { %s117_s11 = scalar_lea.vmem %s20_s10, 512  ;;  %p122_p1 = scmp.lt.s32.totalorder %s20_s10, %s20_s10 }
   0x5   :  { %p118_p0 = scmp.ne.s32.totalorder %s20_s10, %s117_s11  ;;  %p123_p2 = scmp.lt.s32.totalorder %s117_s11, %s117_s11 }
   0x7   :  { %p124_p3 = por %p123_p2, %p122_p1 }
   0x9   :  { %p125_p4 = pnand %p124_p3, %p118_p0 }
   0xb   :  { %128 = shalt.err (!%p125_p4)
}
   0xc   :  { %s176_s12 = smov 128   ;;  %s177_s13 = smov 8  }
   0xd   :  { %25 = dma.hbm_to_vmem [thread:$0]  %s204_s0, 512, %s20_s10, [#allocation4], %s176_s12, %s176_s12, %s177_s13  }
   0xe   :  { %s178_s16 = smov [#allocation6]  }
   0xf   :  { %s35_s17 = sshll.u32 %s178_s16, 4  ;;  %s36_s17 = int_to_ptr.vmem [resolvable:$true] %s35_s17 }
  0x10   :  { %s137_s18 = scalar_lea.vmem %s36_s17, 512  ;;  %p142_p6 = scmp.lt.s32.totalorder %s36_s17, %s36_s17 }
  0x11   :  { %p138_p5 = scmp.ne.s32.totalorder %s36_s17, %s137_s18  ;;  %p143_p7 = scmp.lt.s32.totalorder %s137_s18, %s137_s18 }
  0x13   :  { %p144_p8 = por %p143_p7, %p142_p6 }
  0x15   :  { %p145_p9 = pnand %p144_p8, %p138_p5 }
  0x17   :  { %148 = shalt.err (!%p145_p9)
}
  0x18   :  { %41 = dma.hbm_to_vmem [thread:$0]  %s205_s1, 512, %s36_s17, [#allocation7], %s176_s12, %s176_s12, %s177_s13  }
  0x19   :  { %169 = dma.done.wait [#allocation4], 512  }
  0x1a   :  { %170 = vsyncadd [#allocation4], 4294966784 }
  0x1b   :  { %171 = dma.done.wait [#allocation7], 512  }
  0x1c   :  { %172 = vsyncadd [#allocation7], 4294966784  ;;  %v57_v0 = vld [vmem:[#allocation3] sm:$0xff]  ;;  %v58_v1 = vld [vmem:[#allocation3 + $0x8] sm:$0xff]  ;;  %s179_s0 = smov [#allocation8]  }
  0x1d   :  { %v59_v2 = vld [vmem:[#allocation3 + $0x10] sm:$0xff]  ;;  %v60_v3 = vld [vmem:[#allocation3 + $0x18] sm:$0xff]  ;;  %v61_v4 = vld [vmem:[#allocation6] sm:$0xff]  ;;  %s94_s1 = sshll.u32 %s179_s0, 4  ;;  %s95_s1 = int_to_ptr.vmem [resolvable:$true] %s94_s1 }
  0x1e   :  { %v62_v5 = vld [vmem:[#allocation6 + $0x8] sm:$0xff]  ;;  %v63_v6 = vld [vmem:[#allocation6 + $0x10] sm:$0xff]  ;;  %v64_v7 = vld [vmem:[#allocation6 + $0x18] sm:$0xff]  ;;  %v65_v8 = vmul.f32 %v61_v4, %v57_v0  ;;  %s149_s21 = scalar_lea.vmem %s95_s1, 128  ;;  %p154_p11 = scmp.lt.s32.totalorder %s95_s1, %s95_s1 }
  0x1f   :  { %v66_v9 = vmul.f32 %v62_v5, %v58_v1  ;;  %v67_v10 = vmul.f32 %v63_v6, %v59_v2  ;;  %v68_v11 = vmul.f32 %v64_v7, %v60_v3  ;;  %p150_p10 = scmp.ne.s32.totalorder %s95_s1, %s149_s21  ;;  %p155_p12 = scmp.lt.s32.totalorder %s149_s21, %s149_s21 }
  0x20   :  { %v69_v12 = vsub.f32 1.0, %v65_v8 }
  0x21   :  { %v70_v13 = vsub.f32 1.0, %v66_v9  ;;  %v71_v14 = vsub.f32 1.0, %v67_v10  ;;  %v72_v15 = vsub.f32 1.0, %v68_v11  ;;  %p156_p13 = por %p155_p12, %p154_p11 }
  0x22   :  { %v73_v16 = vmax.f32 %v69_v12, 0.0 }
  0x23   :  { %v74_v17 = vmax.f32 %v70_v13, 0.0  ;;  %v75_v18 = vmax.f32 %v71_v14, 0.0  ;;  %v76_v19 = vmax.f32 %v72_v15, 0.0  ;;  %p157_p0 = pnand %p156_p13, %p150_p10 }
  0x25   :  { %v78_v20 = vadd.f32 %v74_v17, %v73_v16 }
  0x27   :  { %v79_v21 = vadd.f32 %v78_v20, %v75_v18 }
  0x29   :  { %v80_v22 = vadd.f32 %v79_v21, %v76_v19 }
  0x2b   :  { %87 = vst [vmem:[#allocation8] sm:$0xff] %v80_v22 }
  0x2c   :  { %160 = shalt.err (!%p157_p0)
}
  0x2d   :  { %97 = dma.vmem_to_hbm [thread:$0]  %s95_s1, 128, %s206_s2, [#allocation5]  }
  0x2e   :  { %173 = dma.done.wait [#allocation5], 128  }
  0x2f   :  { %174 = vsyncadd [#allocation5], 4294967168 }
  0x30   :  { %101 = vsyncpa [#allocation4], 1 }
  0x31   :  { %102 = vsyncpa [#allocation7], 1 }
  0x32   :  { %103 = vsyncpa [#allocation5], 1 }

</bundles_post_ra>
